<compile_context>
chip_gen: v5e
topology: v5e:2x2
jax: 0.10.0
libtpu: 0.0.40
codegen_flags: <defaults>
</compile_context>

<pallas_src>
import jax
import jax.numpy as jnp
import numpy as np
from jax.experimental import pallas as pl
from jax.experimental.pallas import tpu as pltpu

NUM_ACTIONS = 4                 # stand-in for env.action_space.n (maze: 4 moves)
HID = NUM_ACTIONS * 16          # 64
CRIT = 50                       # critic hidden width
PCRIT = 64                      # critic hidden width padded to a clean lane count
SMALL = 8                       # packed small-output width: [policy(4), vext, vint, pad(2)]


# ----------------------------------------------------------------------------
# shared per-step math (used by both the single-step and the rollout kernels)
# ----------------------------------------------------------------------------
def _cell_step(xg, ge_rep, hx, cx, wgh, wc, bc, whead, bhead):
    """One Worker step given the pre-projected input xg = x@W_ih^T + b."""
    f32 = jnp.float32

    # ---- LSTM gates: only the recurrent half of the matmul stays per-step ----
    gates = xg + jnp.dot(hx, wgh, preferred_element_type=f32)          # (B, 4*HID)
    i_g = jax.nn.sigmoid(gates[:, 0 * HID:1 * HID])
    f_g = jax.nn.sigmoid(gates[:, 1 * HID:2 * HID])
    g_g = jnp.tanh(gates[:, 2 * HID:3 * HID])
    o_g = jax.nn.sigmoid(gates[:, 3 * HID:4 * HID])
    cy = f_g * cx + i_g * g_g
    hy = o_g * jnp.tanh(cy)

    # ---- fused twin critics (padded 50->64 each) ----
    h12 = jnp.maximum(jnp.dot(hy, wc, preferred_element_type=f32) + bc, 0.0)  # (B, 128)

    # ---- fused head: [v_ext, v_int, logits] from ONE block-diagonal matmul ----
    head_in = jnp.concatenate([h12, hy * ge_rep], axis=-1)             # (B, 192)
    head = jnp.dot(head_in, whead, preferred_element_type=f32) + bhead  # (B, 8)
    logits = head[:, :NUM_ACTIONS]
    m = jnp.max(logits, axis=-1, keepdims=True)
    e = jnp.exp(logits - m)
    policy = e / jnp.sum(e, axis=-1, keepdims=True)

    # packed small output: [policy(4), vext, vint, 0, 0]  (cols 6,7 are exact zeros)
    small = jnp.concatenate([policy, head[:, NUM_ACTIONS:]], axis=-1)  # (B, 8)
    return hy, cy, small


# ----------------------------------------------------------------------------
# single-step kernel (matches the module's forward exactly)
# ----------------------------------------------------------------------------
def worker_step_kernel(x_ref, hx_ref, cx_ref, gsum_ref,
                       wgx_ref, wgh_ref, bg_ref, wfcrep_ref,
                       wc_ref, bc_ref, whead_ref, bhead_ref,
                       state_ref, small_ref):
    f32 = jnp.float32
    xg = jnp.dot(x_ref[...], wgx_ref[...], preferred_element_type=f32) + bg_ref[...]
    ge_rep = jnp.dot(gsum_ref[...], wfcrep_ref[...], preferred_element_type=f32)
    hy, cy, small = _cell_step(xg, ge_rep, hx_ref[...], cx_ref[...],
                               wgh_ref[...], wc_ref[...], bc_ref[...],
                               whead_ref[...], bhead_ref[...])
    state_ref[...] = jnp.concatenate([hy, cy], axis=-1)     # lane-dense (B, 128)
    small_ref[...] = small                                  # single (B, 8) store


# ----------------------------------------------------------------------------
# rollout kernel: grid over time CHUNKS, weights + recurrent state VMEM-resident
# ----------------------------------------------------------------------------
def worker_rollout_kernel(hx0_ref, cx0_ref, xg_ref, ge_ref,
                          wgh_ref, wc_ref, bc_ref, whead_ref, bhead_ref,
                          small_ref, state_ref,
                          hx_scr, cx_scr):
    c = pl.program_id(0)
    nc = pl.num_programs(0)

    @pl.when(c == 0)
    def _():
        hx_scr[...] = hx0_ref[...]
        cx_scr[...] = cx0_ref[...]

    hx = hx_scr[...]
    cx = cx_scr[...]
    wgh = wgh_ref[...]
    wc = wc_ref[...]
    bc = bc_ref[...]
    whead = whead_ref[...]
    bhead = bhead_ref[...]

    chunk = xg_ref.shape[0]                 # static
    for step in range(chunk):               # short static inner loop, constant indices
        hx, cx, small = _cell_step(xg_ref[step], ge_ref[step], hx, cx,
                                   wgh, wc, bc, whead, bhead)
        small_ref[0, :, step * SMALL:(step + 1) * SMALL] = small

    hx_scr[...] = hx
    cx_scr[...] = cx

    @pl.when(c == nc - 1)
    def _():
        state_ref[...] = jnp.concatenate([hx, cx], axis=-1)   # written once, at the end


# ----------------------------------------------------------------------------
# parameters
# ----------------------------------------------------------------------------
def init_raw_params(key):
    """Raw parameters in PyTorch layout, mirroring the module's init."""
    ks = jax.random.split(key, 12)

    def kaiming_fan_out(k, shape):           # nn.init.kaiming_normal_ (fan_out, relu)
        fan_out = shape[0]                   # torch Linear weight is (out, in)
        std = np.sqrt(2.0 / fan_out)
        return std * jax.random.normal(k, shape, jnp.float32)

    def torch_linear_bias(k, shape, fan_in):
        bound = 1.0 / np.sqrt(fan_in)
        return jax.random.uniform(k, shape, jnp.float32, -bound, bound)

    bound = 1.0 / np.sqrt(HID)
    return {
        # LSTMCell(HID, HID): gate order i, f, g, o ; biases zeroed by __init__
        "w_ih": jax.random.uniform(ks[0], (4 * HID, HID), jnp.float32, -bound, bound),
        "w_hh": jax.random.uniform(ks[1], (4 * HID, HID), jnp.float32, -bound, bound),
        "b_ih": jnp.zeros((4 * HID,), jnp.float32),
        "b_hh": jnp.zeros((4 * HID,), jnp.float32),
        # fc: Linear(HID, 16, bias=False)
        "wfc": kaiming_fan_out(ks[2], (16, HID)),
        # critic 1
        "wc1": kaiming_fan_out(ks[3], (CRIT, HID)),
        "bc1": torch_linear_bias(ks[4], (CRIT,), HID),
        "wc1o": kaiming_fan_out(ks[5], (1, CRIT)),
        "bc1o": torch_linear_bias(ks[6], (1,), CRIT),
        # critic 2
        "wc2": kaiming_fan_out(ks[7], (CRIT, HID)),
        "bc2": torch_linear_bias(ks[8], (CRIT,), HID),
        "wc2o": kaiming_fan_out(ks[9], (1, CRIT)),
        "bc2o": torch_linear_bias(ks[10], (1,), CRIT),
    }


def prepare_kernel_params(raw):
    """Fold / fuse / pad the raw parameters into the kernel's layout."""
    wg_x = raw["w_ih"].T                                    # (HID, 4*HID)
    wg_h = raw["w_hh"].T                                    # (HID, 4*HID)
    bg = (raw["b_ih"] + raw["b_hh"]).reshape(1, 4 * HID)    # zero per __init__, kept for safety

    # replicate (E) / segment-sum (S) matrices for the bmm-as-matmul trick
    e_mat = np.zeros((16, HID), np.float32)
    s_mat = np.zeros((HID, NUM_ACTIONS), np.float32)
    for a in range(NUM_ACTIONS):
        for k in range(16):
            e_mat[k, a * 16 + k] = 1.0
            s_mat[a * 16 + k, a] = 1.0

    # fold replicate into fc: ge_rep = gsum @ wfc_rep   (HID, HID)
    wfc_rep = raw["wfc"].T @ jnp.asarray(e_mat)

    # fused, lane-padded twin critic hidden layers
    wc = jnp.zeros((HID, 2 * PCRIT), jnp.float32)
    wc = wc.at[:, :CRIT].set(raw["wc1"].T)
    wc = wc.at[:, PCRIT:PCRIT + CRIT].set(raw["wc2"].T)
    bc = jnp.zeros((1, 2 * PCRIT), jnp.float32)
    bc = bc.at[0, :CRIT].set(raw["bc1"])
    bc = bc.at[0, PCRIT:PCRIT + CRIT].set(raw["bc2"])

    # fused block-diagonal head: [h12 | hy*ge_rep] (192) -> [logits(4), vext, vint, 0, 0]
    whead = jnp.zeros((2 * PCRIT + HID, SMALL), jnp.float32)
    whead = whead.at[2 * PCRIT:, :NUM_ACTIONS].set(jnp.asarray(s_mat))      # logits
    whead = whead.at[:CRIT, NUM_ACTIONS].set(raw["wc1o"][0])                # v_ext
    whead = whead.at[PCRIT:PCRIT + CRIT, NUM_ACTIONS + 1].set(raw["wc2o"][0])  # v_int
    bhead = jnp.zeros((1, SMALL), jnp.float32)
    bhead = bhead.at[0, NUM_ACTIONS].set(raw["bc1o"][0])
    bhead = bhead.at[0, NUM_ACTIONS + 1].set(raw["bc2o"][0])

    return {"wg_x": wg_x, "wg_h": wg_h, "bg": bg, "wfc_rep": wfc_rep,
            "wc": wc, "bc": bc, "whead": whead, "bhead": bhead}


# ----------------------------------------------------------------------------
# wrappers
# ----------------------------------------------------------------------------
def worker_forward(x, hx, cx, goals, kp):
    """One Worker step (matches the PyTorch module's forward).
    For repeated stepping use worker_rollout instead (amortizes weight DMA)."""
    b = x.shape[0]
    gsum = goals.sum(axis=1)                 # goal-horizon sum folded outside the kernel

    args = (x, hx, cx, gsum,
            kp["wg_x"], kp["wg_h"], kp["bg"], kp["wfc_rep"],
            kp["wc"], kp["bc"], kp["whead"], kp["bhead"])
    out_shapes = (
        jax.ShapeDtypeStruct((b, 2 * HID), jnp.float32),    # [hy | cy]
        jax.ShapeDtypeStruct((b, SMALL), jnp.float32),      # [policy | vext | vint | pad]
    )
    state, small = pl.pallas_call(
        worker_step_kernel,
        out_shape=out_shapes,
        in_specs=[pl.BlockSpec(memory_space=pltpu.MemorySpace.VMEM) for _ in args],
        out_specs=[pl.BlockSpec(memory_space=pltpu.MemorySpace.VMEM) for _ in out_shapes],
    )(*args)

    hy, cy = state[:, :HID], state[:, HID:]
    policy = small[:, :NUM_ACTIONS]
    vext = small[:, NUM_ACTIONS:NUM_ACTIONS + 1]
    vint = small[:, NUM_ACTIONS + 1:NUM_ACTIONS + 2]
    return policy, hy, cy, vext, vint


def worker_rollout(x_seq, hx, cx, goals_seq, kp, chunk=None):
    """T Worker steps, `chunk` timesteps per grid iteration, weights + state in VMEM."""
    ts, b, _ = x_seq.shape
    if chunk is None:
        chunk = ts
    assert ts % chunk == 0, "rollout length must be a multiple of the chunk size"
    n_chunks = ts // chunk

    # ---- hoisted out of the recurrence: one big matmul each (perf review #1/#2) ----
    xg_seq = x_seq @ kp["wg_x"] + kp["bg"]                  # (TS, B, 4*HID)
    gsum_seq = goals_seq.sum(axis=2)                        # (TS, B, HID)
    ge_seq = gsum_seq @ kp["wfc_rep"]                       # (TS, B, HID)

    weight_args = (kp["wg_h"], kp["wc"], kp["bc"], kp["whead"], kp["bhead"])

    def resident_spec(arr):
        nd = arr.ndim
        return pl.BlockSpec(arr.shape, lambda c, _nd=nd: (0,) * _nd)

    in_specs = ([pl.BlockSpec((b, HID), lambda c: (0, 0)),               # hx0
                 pl.BlockSpec((b, HID), lambda c: (0, 0)),               # cx0
                 pl.BlockSpec((chunk, b, 4 * HID), lambda c: (c, 0, 0)),  # xg chunk
                 pl.BlockSpec((chunk, b, HID), lambda c: (c, 0, 0))]      # ge chunk
                + [resident_spec(w) for w in weight_args])
    out_specs = [
        pl.BlockSpec((1, b, chunk * SMALL), lambda c: (c, 0, 0)),        # per-chunk slab
        pl.BlockSpec((b, 2 * HID), lambda c: (0, 0)),                    # final [hy|cy]
    ]
    out_shapes = (
        jax.ShapeDtypeStruct((n_chunks, b, chunk * SMALL), jnp.float32),
        jax.ShapeDtypeStruct((b, 2 * HID), jnp.float32),
    )

    small_raw, state = pl.pallas_call(
        worker_rollout_kernel,
        grid=(n_chunks,),
        in_specs=in_specs,
        out_specs=out_specs,
        out_shape=out_shapes,
        scratch_shapes=[pltpu.VMEM((b, HID), jnp.float32),   # hx carry
                        pltpu.VMEM((b, HID), jnp.float32)],  # cx carry
        compiler_params=pltpu.CompilerParams(dimension_semantics=("arbitrary",)),
    )(hx, cx, xg_seq, ge_seq, *weight_args)

    # unpack the lane-packed (n_chunks, B, chunk*SMALL) slab -> (TS, B, SMALL)
    small_seq = (small_raw.reshape(n_chunks, b, chunk, SMALL)
                 .transpose(0, 2, 1, 3).reshape(ts, b, SMALL))
    policy_seq = small_seq[:, :, :NUM_ACTIONS]
    vext_seq = small_seq[:, :, NUM_ACTIONS:NUM_ACTIONS + 1]
    vint_seq = small_seq[:, :, NUM_ACTIONS + 1:NUM_ACTIONS + 2]
    return policy_seq, vext_seq, vint_seq, state[:, :HID], state[:, HID:]


# ----------------------------------------------------------------------------
# pure-JAX reference (mirrors the PyTorch forward) for validation
# ----------------------------------------------------------------------------
def worker_reference(x, hx, cx, goals, raw):
    gates = x @ raw["w_ih"].T + hx @ raw["w_hh"].T + raw["b_ih"] + raw["b_hh"]
    gi, gf, gg, go = jnp.split(gates, 4, axis=-1)
    cy = jax.nn.sigmoid(gf) * cx + jax.nn.sigmoid(gi) * jnp.tanh(gg)
    hy = jax.nn.sigmoid(go) * jnp.tanh(cy)
    vext = jnp.maximum(hy @ raw["wc1"].T + raw["bc1"], 0.0) @ raw["wc1o"].T + raw["bc1o"]
    vint = jnp.maximum(hy @ raw["wc2"].T + raw["bc2"], 0.0) @ raw["wc2o"].T + raw["bc2o"]
    ge = goals.sum(axis=1) @ raw["wfc"].T
    we = hy.reshape(hy.shape[0], NUM_ACTIONS, 16)
    logits = jnp.einsum("bak,bk->ba", we, ge)
    policy = jax.nn.softmax(logits, axis=-1)
    return policy, hy, cy, vext, vint


if __name__ == "__main__":
    key = jax.random.PRNGKey(0)
    kparam, kx, kh, kc, kg, kxs, kgs = jax.random.split(key, 7)

    B, TG, TS, CHUNK = 8, 8, 8, 4        # batch, goal horizon, rollout length, chunk
    raw = init_raw_params(kparam)
    kparams = prepare_kernel_params(raw)

    x = jax.random.normal(kx, (B, HID), jnp.float32)
    hx = jax.random.normal(kh, (B, HID), jnp.float32)
    cx = jax.random.normal(kc, (B, HID), jnp.float32)
    goals = jax.random.normal(kg, (B, TG, HID), jnp.float32)

    # ---- single-step kernel (module forward) ----
    outs = jax.block_until_ready(worker_forward(x, hx, cx, goals, kparams))
    refs = worker_reference(x, hx, cx, goals, raw)
    for o, r in zip(outs, refs):
        np.testing.assert_allclose(np.asarray(o), np.asarray(r), rtol=2e-3, atol=2e-3)

    # ---- rollout kernel (TS steps, CHUNK per grid iteration) ----
    x_seq = jax.random.normal(kxs, (TS, B, HID), jnp.float32)
    goals_seq = jax.random.normal(kgs, (TS, B, TG, HID), jnp.float32)
    pol_seq, vext_seq, vint_seq, hy_f, cy_f = jax.block_until_ready(
        worker_rollout(x_seq, hx, cx, goals_seq, kparams, chunk=CHUNK))

    h, c = hx, cx
    for t in range(TS):
        pol_r, h, c, ve_r, vi_r = worker_reference(x_seq[t], h, c, goals_seq[t], raw)
        np.testing.assert_allclose(np.asarray(pol_seq[t]), np.asarray(pol_r),
                                   rtol=2e-3, atol=2e-3)
        np.testing.assert_allclose(np.asarray(vext_seq[t]), np.asarray(ve_r),
                                   rtol=2e-3, atol=2e-3)
        np.testing.assert_allclose(np.asarray(vint_seq[t]), np.asarray(vi_r),
                                   rtol=2e-3, atol=2e-3)
    np.testing.assert_allclose(np.asarray(hy_f), np.asarray(h), rtol=2e-3, atol=2e-3)
    np.testing.assert_allclose(np.asarray(cy_f), np.asarray(c), rtol=2e-3, atol=2e-3)

    print("KERNEL_OK")
</pallas_src>

<mosaic_0001>
module attributes {stable_mosaic.version = 11 : i64} {
  func.func @worker_step_kernel(%arg0: memref<8x64xf32, #tpu.memory_space<vmem>>, %arg1: memref<8x64xf32, #tpu.memory_space<vmem>>, %arg2: memref<8x64xf32, #tpu.memory_space<vmem>>, %arg3: memref<8x64xf32, #tpu.memory_space<vmem>>, %arg4: memref<64x256xf32, #tpu.memory_space<vmem>>, %arg5: memref<64x256xf32, #tpu.memory_space<vmem>>, %arg6: memref<1x256xf32, #tpu.memory_space<vmem>>, %arg7: memref<64x64xf32, #tpu.memory_space<vmem>>, %arg8: memref<64x128xf32, #tpu.memory_space<vmem>>, %arg9: memref<1x128xf32, #tpu.memory_space<vmem>>, %arg10: memref<192x8xf32, #tpu.memory_space<vmem>>, %arg11: memref<1x8xf32, #tpu.memory_space<vmem>>, %arg12: memref<8x128xf32, #tpu.memory_space<vmem>>, %arg13: memref<8x8xf32, #tpu.memory_space<vmem>>) attributes {dimension_semantics = [], scalar_prefetch = 0 : i64, scratch_operands = 0 : i64, tpu.core_type = #tpu.core_type<tc>} {
    %c0 = arith.constant 0 : index
    %c0_0 = arith.constant 0 : index
    %0 = vector.load %arg0[%c0, %c0_0] : memref<8x64xf32, #tpu.memory_space<vmem>>, vector<8x64xf32>
    %c0_1 = arith.constant 0 : index
    %c0_2 = arith.constant 0 : index
    %1 = vector.load %arg4[%c0_1, %c0_2] : memref<64x256xf32, #tpu.memory_space<vmem>>, vector<64x256xf32>
    %cst = arith.constant dense<0.000000e+00> : vector<8x256xf32>
    %2 = tpu.matmul %0, %1, %cst {dimension_numbers = #tpu.dot_dimension_numbers<[1], [0], [0], [1], [0, 0, 1, 1], [], []>} : vector<8x64xf32>, vector<64x256xf32>, vector<8x256xf32> -> vector<8x256xf32>
    %c0_3 = arith.constant 0 : index
    %c0_4 = arith.constant 0 : index
    %3 = vector.load %arg6[%c0_3, %c0_4] : memref<1x256xf32, #tpu.memory_space<vmem>>, vector<1x256xf32>
    %4 = vector.broadcast %3 : vector<1x256xf32> to vector<8x256xf32>
    %5 = arith.addf %2, %4 : vector<8x256xf32>
    %c0_5 = arith.constant 0 : index
    %c0_6 = arith.constant 0 : index
    %6 = vector.load %arg3[%c0_5, %c0_6] : memref<8x64xf32, #tpu.memory_space<vmem>>, vector<8x64xf32>
    %c0_7 = arith.constant 0 : index
    %c0_8 = arith.constant 0 : index
    %7 = vector.load %arg7[%c0_7, %c0_8] : memref<64x64xf32, #tpu.memory_space<vmem>>, vector<64x64xf32>
    %cst_9 = arith.constant dense<0.000000e+00> : vector<8x64xf32>
    %8 = tpu.matmul %6, %7, %cst_9 {dimension_numbers = #tpu.dot_dimension_numbers<[1], [0], [0], [1], [0, 0, 1, 1], [], []>} : vector<8x64xf32>, vector<64x64xf32>, vector<8x64xf32> -> vector<8x64xf32>
    %c0_10 = arith.constant 0 : index
    %c0_11 = arith.constant 0 : index
    %9 = vector.load %arg1[%c0_10, %c0_11] : memref<8x64xf32, #tpu.memory_space<vmem>>, vector<8x64xf32>
    %c0_12 = arith.constant 0 : index
    %c0_13 = arith.constant 0 : index
    %10 = vector.load %arg2[%c0_12, %c0_13] : memref<8x64xf32, #tpu.memory_space<vmem>>, vector<8x64xf32>
    %c0_14 = arith.constant 0 : index
    %c0_15 = arith.constant 0 : index
    %11 = vector.load %arg5[%c0_14, %c0_15] : memref<64x256xf32, #tpu.memory_space<vmem>>, vector<64x256xf32>
    %c0_16 = arith.constant 0 : index
    %c0_17 = arith.constant 0 : index
    %12 = vector.load %arg8[%c0_16, %c0_17] : memref<64x128xf32, #tpu.memory_space<vmem>>, vector<64x128xf32>
    %c0_18 = arith.constant 0 : index
    %c0_19 = arith.constant 0 : index
    %13 = vector.load %arg9[%c0_18, %c0_19] : memref<1x128xf32, #tpu.memory_space<vmem>>, vector<1x128xf32>
    %c0_20 = arith.constant 0 : index
    %c0_21 = arith.constant 0 : index
    %14 = vector.load %arg10[%c0_20, %c0_21] : memref<192x8xf32, #tpu.memory_space<vmem>>, vector<192x8xf32>
    %c0_22 = arith.constant 0 : index
    %c0_23 = arith.constant 0 : index
    %15 = vector.load %arg11[%c0_22, %c0_23] : memref<1x8xf32, #tpu.memory_space<vmem>>, vector<1x8xf32>
    %cst_24 = arith.constant dense<0.000000e+00> : vector<8x256xf32>
    %16 = tpu.matmul %9, %11, %cst_24 {dimension_numbers = #tpu.dot_dimension_numbers<[1], [0], [0], [1], [0, 0, 1, 1], [], []>} : vector<8x64xf32>, vector<64x256xf32>, vector<8x256xf32> -> vector<8x256xf32>
    %17 = arith.addf %5, %16 : vector<8x256xf32>
    %18 = vector.extract_strided_slice %17 {offsets = [0, 0], sizes = [8, 64], strides = [1, 1]} : vector<8x256xf32> to vector<8x64xf32>
    %19 = arith.negf %18 : vector<8x64xf32>
    %20 = math.exp %19 : vector<8x64xf32>
    %cst_25 = arith.constant 1.000000e+00 : f32
    %21 = vector.broadcast %cst_25 : f32 to vector<8x64xf32>
    %22 = arith.addf %21, %20 : vector<8x64xf32>
    %23 = arith.divf %21, %22 : vector<8x64xf32>
    %24 = vector.extract_strided_slice %17 {offsets = [0, 64], sizes = [8, 64], strides = [1, 1]} : vector<8x256xf32> to vector<8x64xf32>
    %25 = arith.negf %24 : vector<8x64xf32>
    %26 = math.exp %25 : vector<8x64xf32>
    %cst_26 = arith.constant 1.000000e+00 : f32
    %27 = vector.broadcast %cst_26 : f32 to vector<8x64xf32>
    %28 = arith.addf %27, %26 : vector<8x64xf32>
    %29 = arith.divf %27, %28 : vector<8x64xf32>
    %30 = vector.extract_strided_slice %17 {offsets = [0, 128], sizes = [8, 64], strides = [1, 1]} : vector<8x256xf32> to vector<8x64xf32>
    %31 = math.tanh %30 : vector<8x64xf32>
    %32 = vector.extract_strided_slice %17 {offsets = [0, 192], sizes = [8, 64], strides = [1, 1]} : vector<8x256xf32> to vector<8x64xf32>
    %33 = arith.negf %32 : vector<8x64xf32>
    %34 = math.exp %33 : vector<8x64xf32>
    %cst_27 = arith.constant 1.000000e+00 : f32
    %35 = vector.broadcast %cst_27 : f32 to vector<8x64xf32>
    %36 = arith.addf %35, %34 : vector<8x64xf32>
    %37 = arith.divf %35, %36 : vector<8x64xf32>
    %38 = arith.mulf %29, %10 : vector<8x64xf32>
    %39 = arith.mulf %23, %31 : vector<8x64xf32>
    %40 = arith.addf %38, %39 : vector<8x64xf32>
    %41 = math.tanh %40 : vector<8x64xf32>
    %42 = arith.mulf %37, %41 : vector<8x64xf32>
    %cst_28 = arith.constant dense<0.000000e+00> : vector<8x128xf32>
    %43 = tpu.matmul %42, %12, %cst_28 {dimension_numbers = #tpu.dot_dimension_numbers<[1], [0], [0], [1], [0, 0, 1, 1], [], []>} : vector<8x64xf32>, vector<64x128xf32>, vector<8x128xf32> -> vector<8x128xf32>
    %44 = vector.broadcast %13 : vector<1x128xf32> to vector<8x128xf32>
    %45 = arith.addf %43, %44 : vector<8x128xf32>
    %cst_29 = arith.constant 0.000000e+00 : f32
    %46 = vector.broadcast %cst_29 : f32 to vector<8x128xf32>
    %47 = arith.maximumf %45, %46 : vector<8x128xf32>
    %48 = arith.mulf %42, %8 : vector<8x64xf32>
    %49 = tpu.concatenate %47, %48 in 1 : vector<8x128xf32>, vector<8x64xf32> -> vector<8x192xf32>
    %cst_30 = arith.constant dense<0.000000e+00> : vector<8x8xf32>
    %50 = tpu.matmul %49, %14, %cst_30 {dimension_numbers = #tpu.dot_dimension_numbers<[1], [0], [0], [1], [0, 0, 1, 1], [], []>} : vector<8x192xf32>, vector<192x8xf32>, vector<8x8xf32> -> vector<8x8xf32>
    %51 = vector.broadcast %15 : vector<1x8xf32> to vector<8x8xf32>
    %52 = arith.addf %50, %51 : vector<8x8xf32>
    %53 = vector.extract_strided_slice %52 {offsets = [0, 0], sizes = [8, 4], strides = [1, 1]} : vector<8x8xf32> to vector<8x4xf32>
    %cst_31 = arith.constant dense<0xFF800000> : vector<8xf32>
    %54 = vector.multi_reduction <maximumf>, %53, %cst_31 [1] : vector<8x4xf32> to vector<8xf32>
    %55 = vector.shape_cast %54 : vector<8xf32> to vector<8x1xf32>
    %56 = vector.broadcast %55 : vector<8x1xf32> to vector<8x4xf32>
    %57 = arith.subf %53, %56 : vector<8x4xf32>
    %58 = math.exp %57 : vector<8x4xf32>
    %cst_32 = arith.constant dense<0.000000e+00> : vector<8xf32>
    %59 = vector.multi_reduction <add>, %58, %cst_32 [1] : vector<8x4xf32> to vector<8xf32>
    %60 = vector.shape_cast %59 : vector<8xf32> to vector<8x1xf32>
    %61 = vector.broadcast %60 : vector<8x1xf32> to vector<8x4xf32>
    %62 = arith.divf %58, %61 : vector<8x4xf32>
    %63 = vector.extract_strided_slice %52 {offsets = [0, 4], sizes = [8, 4], strides = [1, 1]} : vector<8x8xf32> to vector<8x4xf32>
    %64 = tpu.concatenate %62, %63 in 1 : vector<8x4xf32>, vector<8x4xf32> -> vector<8x8xf32>
    %65 = tpu.concatenate %42, %40 in 1 : vector<8x64xf32>, vector<8x64xf32> -> vector<8x128xf32>
    %c0_33 = arith.constant 0 : index
    %c0_34 = arith.constant 0 : index
    %66 = vector.load %arg12[%c0_33, %c0_34] : memref<8x128xf32, #tpu.memory_space<vmem>>, vector<8x128xf32>
    tpu.vector_store %arg12[%c0_33, %c0_34], %65 {strides = array<i32>} : memref<8x128xf32, #tpu.memory_space<vmem>>, vector<8x128xf32>,
    %c0_35 = arith.constant 0 : index
    %c0_36 = arith.constant 0 : index
    %67 = vector.load %arg13[%c0_35, %c0_36] : memref<8x8xf32, #tpu.memory_space<vmem>>, vector<8x8xf32>
    tpu.vector_store %arg13[%c0_35, %c0_36], %64 {strides = array<i32>} : memref<8x8xf32, #tpu.memory_space<vmem>>, vector<8x8xf32>,
    return
  }
}

</mosaic_0001>

<bundles_post_ra>
// kernel: tpu_custom_call.1
= control target key start
LH: loop header
LB: loop body
LE: loop exit
PB: predicated region body
PF: predicated region fallthrough
CT: control target
= control target key end

     0   :  { %19 = vsyncpa [#allocation3], 0  ;;  %s966_s0 = inlined_call_operand.vmem [shape: f32[8,64], index: 0, kind: input, shape index: {}]   ;;  %s967_s1 = inlined_call_operand.vmem [shape: f32[8,64], index: 1, kind: input, shape index: {}]   ;;  %s968_s2 = inlined_call_operand.hbm [shape: f32[8,64], index: 2, kind: input, shape index: {}]   ;;  %s969_s3 = inlined_call_operand.hbm [shape: f32[8,64], index: 3, kind: input, shape index: {}]   ;;  %s970_s4 = inlined_call_operand.vmem [shape: f32[64,256], index: 4, kind: input, shape index: {}]   ;;  %s971_s5 = inlined_call_operand.hbm [shape: f32[64,256], index: 5, kind: input, shape index: {}]   ;;  %s972_s6 = inlined_call_operand.vmem [shape: f32[1,256], index: 6, kind: input, shape index: {}]   ;;  %s973_s7 = inlined_call_operand.vmem [shape: f32[64,64], index: 7, kind: input, shape index: {}]   ;;  %s974_s8 = inlined_call_operand.hbm [shape: f32[64,128], index: 8, kind: input, shape index: {}]   ;;  %s975_s9 = inlined_call_operand.vmem [shape: f32[1,128], index: 9, kind: input, shape index: {}]   ;;  %s976_s10 = inlined_call_operand.vmem [shape: f32[192,8], index: 10, kind: input, shape index: {}]   ;;  %s977_s11 = inlined_call_operand.vmem [shape: f32[1,8], index: 11, kind: input, shape index: {}]   ;;  %s978_s12 = inlined_call_operand.hbm [shape: f32[8,128], index: 12, kind: output, shape index: {0}]   ;;  %s979_s13 = inlined_call_operand.hbm [shape: f32[8,8], index: 13, kind: output, shape index: {1}]  }
   0x1   :  { %20 = vsyncpa [#allocation6], 0 }
   0x2   :  { %21 = vsyncpa [#allocation9], 0 }
   0x3   :  { %22 = vsyncpa [#allocation4], 0  ;;  %s44_s27 = sshll.u32 %s969_s3, 4  ;;  %s45_s27 = int_to_ptr.hbm [resolvable:$true] %s44_s27 }
   0x4   :  { %23 = vsyncpa [#allocation12], 0  ;;  %s692_s28 = smov [#allocation5]   ;;  %s33_s15 = sshll.u32 %s968_s2, 4  ;;  %s34_s15 = int_to_ptr.hbm [resolvable:$true] %s33_s15 }
   0x5   :  { %s46_s29 = sshll.u32 %s692_s28, 4  ;;  %s693_s16 = smov [#allocation2]   ;;  %s47_s29 = int_to_ptr.vmem [resolvable:$true] %s46_s29 }
   0x6   :  { %49 = dma.hbm_to_vmem [thread:$0]  %s45_s27, 128, %s47_s29, [#allocation6]  }
   0x7   :  { %s35_s17 = sshll.u32 %s693_s16, 4  ;;  %s56_s20 = sshll.u32 %s971_s5, 4  ;;  %s36_s17 = int_to_ptr.vmem [resolvable:$true] %s35_s17  ;;  %s57_s20 = int_to_ptr.hbm [resolvable:$true] %s56_s20 }
   0x8   :  { %38 = dma.hbm_to_vmem [thread:$0]  %s34_s15, 128, %s36_s17, [#allocation3]  }
   0x9   :  { %s694_s3 = smov [#allocation7]   ;;  %s73_s24 = sshll.u32 %s974_s8, 4  ;;  %s74_s24 = int_to_ptr.hbm [resolvable:$true] %s73_s24 }
   0xa   :  { %s58_s21 = sshll.u32 %s694_s3, 4  ;;  %s695_s25 = smov 256   ;;  %s59_s21 = int_to_ptr.vmem [resolvable:$true] %s58_s21 }
   0xb   :  { %s696_s2 = smov 16   ;;  %s697_s26 = smov [#allocation8]  }
   0xc   :  { %64 = dma.hbm_to_vmem [thread:$0]  %s57_s20, 2048, %s59_s21, [#allocation6], %s695_s25, %s695_s25, %s696_s2  }
   0xd   :  { %s75_s27 = sshll.u32 %s697_s26, 4  ;;  %s698_s28 = smov 128   ;;  %s76_s27 = int_to_ptr.vmem [resolvable:$true] %s75_s27 }
   0xe   :  { %s699_s29 = smov 8  }
   0xf   :  { %81 = dma.hbm_to_vmem [thread:$0]  %s74_s24, 1024, %s76_s27, [#allocation9], %s698_s28, %s698_s28, %s699_s29  }
  0x10   :  { %682 = dma.done.wait [#allocation3], 128  }
  0x11   :  { %683 = vsyncadd [#allocation3], 4294967168 }
  0x12   :  { %684 = dma.done.wait [#allocation6], 2176  }
  0x13   :  { %685 = vsyncadd [#allocation6], 4294965120 }
  0x14   :  { %686 = dma.done.wait [#allocation9], 1024  }
  0x15   :  { %687 = vsyncadd [#allocation9], 4294966272  ;;  %v119_v0 = vld [vmem:[%s970_s4 + $0x70] sm:$0xff]  ;;  %v219_v1 = vld [vmem:[#allocation7 + $0x70] sm:$0xff]  ;;  %s700_s16 = smov 64   ;;  %vm127_vm0 = vcmask 523264  }
  0x16   :  { %v117_v2 = vld [vmem:[%s970_s4 + $0x60] sm:$0xff]  ;;  %139 = vmatpush.msra.mxu0 %v119_v0  ;;  %266 = vmatpush.msra.mxu3 %v219_v1  ;;  %v217_v3 = vld [vmem:[#allocation7 + $0x60] sm:$0xff]  ;;  %v120_v8 = vld [vmem:[%s970_s4 + $0x78] sm:$0xff]  ;;  %vm434_vm9 = vcmask 31744   ;;  %vm463_vm14 = vcmask 64512  }
  0x17   :  { %v115_v4 = vld [vmem:[%s970_s4 + $0x50] sm:$0xff]  ;;  %v215_v5 = vld [vmem:[#allocation7 + $0x50] sm:$0xff]  ;;  %v118_v9 = vld [vmem:[%s970_s4 + $0x68] sm:$0xff]  ;;  %159 = vmatpush.msra.mxu1 %v120_v8 }
  0x18   :  { %140 = vmatpush.msra.mxu0 %v117_v2  ;;  %267 = vmatpush.msra.mxu3 %v217_v3  ;;  %v113_v6 = vld [vmem:[%s970_s4 + $0x40] sm:$0xff]  ;;  %v213_v7 = vld [vmem:[#allocation7 + $0x40] sm:$0xff]  ;;  %v116_v12 = vld [vmem:[%s970_s4 + $0x58] sm:$0xff] }
  0x19   :  { %v111_v10 = vld [vmem:[%s970_s4 + $0x30] sm:$0xff]  ;;  %v211_v11 = vld [vmem:[#allocation7 + $0x30] sm:$0xff]  ;;  %160 = vmatpush.msra.mxu1 %v118_v9  ;;  %v114_v15 = vld [vmem:[%s970_s4 + $0x48] sm:$0xff] }
  0x1a   :  { %141 = vmatpush.msra.mxu0 %v115_v4  ;;  %268 = vmatpush.msra.mxu3 %v215_v5  ;;  %v109_v13 = vld [vmem:[%s970_s4 + $0x20] sm:$0xff]  ;;  %v209_v14 = vld [vmem:[#allocation7 + $0x20] sm:$0xff]  ;;  %v112_v19 = vld [vmem:[%s970_s4 + $0x38] sm:$0xff] }
  0x1b   :  { %v107_v16 = vld [vmem:[%s970_s4 + $0x10] sm:$0xff]  ;;  %v207_v17 = vld [vmem:[#allocation7 + $0x10] sm:$0xff]  ;;  %161 = vmatpush.msra.mxu1 %v116_v12  ;;  %v220_v23 = vld [vmem:[#allocation7 + $0x78] sm:$0xff] }
  0x1c   :  { %142 = vmatpush.msra.mxu0 %v113_v6  ;;  %269 = vmatpush.msra.mxu3 %v213_v7  ;;  %v105_v18 = vld [vmem:[%s970_s4] sm:$0xff]  ;;  %v205_v21 = vld [vmem:[#allocation7] sm:$0xff]  ;;  %v110_v25 = vld [vmem:[%s970_s4 + $0x28] sm:$0xff] }
  0x1d   :  { %v204_v20 = vld [vmem:[#allocation2] sm:$0xff]  ;;  %162 = vmatpush.msra.mxu1 %v114_v15  ;;  %v218_v26 = vld [vmem:[#allocation7 + $0x68] sm:$0xff]  ;;  %v216_v28 = vld [vmem:[#allocation7 + $0x58] sm:$0xff] }
  0x1e   :  { %143 = vmatpush.msra.mxu0 %v111_v10  ;;  %270 = vmatpush.msra.mxu3 %v211_v11  ;;  %v203_v22 = vld [vmem:[%s967_s1] sm:$0xff]  ;;  %v108_v27 = vld [vmem:[%s970_s4 + $0x18] sm:$0xff]  ;;  %v106_v29 = vld [vmem:[%s970_s4 + $0x8] sm:$0xff] }
  0x1f   :  { %340 = vrot.lane.b32.xlu0 %v204_v20, %s700_s16  ;;  %v104_v24 = vld [vmem:[%s966_s0] sm:$0xff]  ;;  %163 = vmatpush.msra.mxu1 %v112_v19  ;;  %v214_v30 = vld [vmem:[#allocation7 + $0x48] sm:$0xff]  ;;  %v212_v31 = vld [vmem:[#allocation7 + $0x38] sm:$0xff]  ;;  %s483_s0 = sshll.u32 %s979_s13, 4  ;;  %s484_s0 = int_to_ptr.hbm [resolvable:$true] %s483_s0 }
  0x20   :  { %144 = vmatpush.msra.mxu0 %v109_v13  ;;  %271 = vmatpush.msra.mxu3 %v209_v14  ;;  %v210_v32 = vld [vmem:[#allocation7 + $0x28] sm:$0xff]  ;;  %v208_v33 = vld [vmem:[#allocation7 + $0x18] sm:$0xff]  ;;  %v121_v36 = vld [vmem:[%s972_s6] sm:$0x3] }
  0x21   :  { %164 = vmatpush.msra.mxu1 %v110_v25  ;;  %v206_v34 = vld [vmem:[#allocation7 + $0x8] sm:$0xff]  ;;  %v178_v37 = vld [vmem:[%s973_s7 + $0x30] sm:$0xff]  ;;  %v177_v38 = vld [vmem:[%s973_s7 + $0x28] sm:$0xff]  ;;  %v123_v40 = vperm.slane %v121_v36, 0  ;;  %v124_v53 = vperm.slane %v121_v36, 1 }
  0x22   :  { %145 = vmatpush.msra.mxu0 %v107_v16  ;;  %272 = vmatpush.msra.mxu3 %v207_v17  ;;  %v179_v35 = vld [vmem:[%s973_s7 + $0x38] sm:$0xff]  ;;  %v176_v39 = vld [vmem:[%s973_s7 + $0x20] sm:$0xff]  ;;  %v174_v44 = vld [vmem:[%s973_s7 + $0x10] sm:$0xff] }
  0x23   :  { %165 = vmatpush.msra.mxu1 %v108_v27  ;;  %191 = vmatpush.msra.mxu2 %v179_v35  ;;  %v175_v41 = vld [vmem:[%s973_s7 + $0x18] sm:$0xff]  ;;  %v173_v45 = vld [vmem:[%s973_s7 + $0x8] sm:$0xff]  ;;  %v172_v48 = vld [vmem:[%s973_s7] sm:$0xff] }
  0x24   :  { %146 = vmatpush.msra.mxu0 %v105_v18  ;;  %273 = vmatpush.msra.mxu3 %v205_v21  ;;  %v171_v49 = vld [vmem:[#allocation5] sm:$0xff]  ;;  %v227_v11 = vld [vmem:[#allocation8 + $0x30] sm:$0xff]  ;;  %v226_v13 = vld [vmem:[#allocation8 + $0x28] sm:$0xff] }
  0x25   :  { %503 = vmatmul.msk.f32.vlgmr.msra.gmra.mxu3 %vm127_vm0, %v203_v22  ;;  %500 = vmatmul.msk.f32.vlgmr.msra.gmra.mxu0 %vm127_vm0, %v104_v24  ;;  %v228_v10 = vld [vmem:[#allocation8 + $0x38] sm:$0xff]  ;;  %v225_v15 = vld [vmem:[#allocation8 + $0x20] sm:$0xff]  ;;  %v223_v18 = vld [vmem:[#allocation8 + $0x10] sm:$0xff] }
  0x26   :  { %286 = vmatpush.msrb.mxu0 %v220_v23  ;;  %166 = vmatpush.msra.mxu1 %v106_v29  ;;  %v224_v17 = vld [vmem:[#allocation8 + $0x18] sm:$0xff]  ;;  %v222_v20 = vld [vmem:[#allocation8 + $0x8] sm:$0xff]  ;;  %v221_v23 = vld [vmem:[#allocation8] sm:$0xff] }
  0x27   :  { %501 = vmatmul.msk.f32.vlgmr.msra.gmra.mxu1 %vm127_vm0, %v104_v24  ;;  %192 = vmatpush.msra.mxu2 %v178_v37  ;;  %v252_v35 = vld [vmem:[%s976_s10 + $0xb0] sm:$0xff]  ;;  %v251_v36 = vld [vmem:[%s976_s10 + $0xa8] sm:$0xff]  ;;  %v245_v37 = vld [vmem:[%s976_s10 + $0x78] sm:$0xff] }
  0x28   :  { %287 = vmatpush.msrb.mxu0 %v218_v26  ;;  %368 = vmatpush.msrb.mxu1 %v228_v10 }
  0x29   :  { %193 = vmatpush.msra.mxu2 %v177_v38  ;;  %v250_v38 = vld [vmem:[%s976_s10 + $0xa0] sm:$0xff] }
  0x2a   :  { %288 = vmatpush.msrb.mxu0 %v216_v28  ;;  %369 = vmatpush.msrb.mxu1 %v227_v11 }
  0x2b   :  { %194 = vmatpush.msra.mxu2 %v176_v39  ;;  %v249_v39 = vld [vmem:[%s976_s10 + $0x98] sm:$0xff] }
  0x2c   :  { %289 = vmatpush.msrb.mxu0 %v214_v30  ;;  %370 = vmatpush.msrb.mxu1 %v226_v13 }
  0x2d   :  { %195 = vmatpush.msra.mxu2 %v175_v41  ;;  %v247_v41 = vld [vmem:[%s976_s10 + $0x88] sm:$0xff] }
  0x2e   :  { %290 = vmatpush.msrb.mxu0 %v212_v31  ;;  %371 = vmatpush.msrb.mxu1 %v225_v15 }
  0x2f   :  { %196 = vmatpush.msra.mxu2 %v174_v44 }
  0x30   :  { %291 = vmatpush.msrb.mxu0 %v210_v32  ;;  %372 = vmatpush.msrb.mxu1 %v224_v17 }
  0x31   :  { %197 = vmatpush.msra.mxu2 %v173_v45 }
  0x32   :  { %292 = vmatpush.msrb.mxu0 %v208_v33  ;;  %373 = vmatpush.msrb.mxu1 %v223_v18 }
  0x33   :  { %198 = vmatpush.msra.mxu2 %v172_v48  ;;  %v243_v48 = vld [vmem:[%s976_s10 + $0x68] sm:$0xff] }
  0x34   :  { %293 = vmatpush.msrb.mxu0 %v206_v34  ;;  %502 = vmatmul.msk.f32.vlgmr.msra.gmra.mxu2 %vm127_vm0, %v171_v49  ;;  %v253_v34 = vld [vmem:[%s976_s10 + $0xb8] sm:$0xff]  ;;  %v242_v49 = vld [vmem:[%s976_s10 + $0x60] sm:$0xff] }
  0x35   :  { %504 = vmatmul.msk.f32.vlgmr.msrb.gmra.mxu0 %vm127_vm0, %v203_v22  ;;  %374 = vmatpush.msrb.mxu1 %v222_v20 }
  0x36   :  { %422 = vmatpush.msrb.mxu3 %v253_v34  ;;  %394 = vmatpush.msrb.mxu2 %v245_v37 }
  0x37   :  { %375 = vmatpush.msrb.mxu1 %v221_v23 }
  0x38   :  { %423 = vmatpush.msrb.mxu3 %v252_v35 }
  0x3a   :  { %424 = vmatpush.msrb.mxu3 %v251_v36 }
  0x3c   :  { %425 = vmatpush.msrb.mxu3 %v250_v38 }
  0x3e   :  { %426 = vmatpush.msrb.mxu3 %v249_v39 }
  0x91   :  { %v341_v14 = vpop.permute.xlu0 %340 }
  0xa2   :  { %v148_v42 = vpop.f32.mrf.mxu0 }
  0xa3   :  { %v149_v43 = vadd.f32 %v148_v42, %v123_v40  ;;  %v248_v40 = vld [vmem:[%s976_s10 + $0x90] sm:$0xff]  ;;  %v246_v42 = vld [vmem:[%s976_s10 + $0x80] sm:$0xff] }
  0xa4   :  { %v168_v54 = vpop.f32.mrf.mxu1  ;;  %427 = vmatpush.msrb.mxu3 %v248_v40 }
  0xa5   :  { %v169_v55 = vadd.f32 %v168_v54, %v124_v53  ;;  %v238_v53 = vld [vmem:[%s976_s10 + $0x40] sm:$0xff]  ;;  %v237_v54 = vld [vmem:[%s976_s10 + $0x38] sm:$0xff] }
  0xa6   :  { %428 = vmatpush.msrb.mxu3 %v247_v41 }
  0xa8   :  { %v275_v46 = vpop.f32.mrf.mxu3  ;;  %429 = vmatpush.msrb.mxu3 %v246_v42 }
  0xa9   :  { %v298_v47 = vadd.f32 %v275_v46, %v149_v43 }
  0xab   :  { %v505_v50 = vmul.f32 -1.442695, %v298_v47  ;;  %v244_v47 = vld [vmem:[%s976_s10 + $0x70] sm:$0xff] }
  0xac   :  { %395 = vmatpush.msrb.mxu2 %v244_v47 }
  0xad   :  { %522 = vpow2.f32 %v505_v50  ;;  %v241_v50 = vld [vmem:[%s976_s10 + $0x58] sm:$0xff] }
  0xae   :  { %396 = vmatpush.msrb.mxu2 %v243_v48 }
  0xb0   :  { %397 = vmatpush.msrb.mxu2 %v242_v49 }
  0xb2   :  { %v295_v56 = vpop.f32.mrf.mxu0  ;;  %398 = vmatpush.msrb.mxu2 %v241_v50 }
  0xb3   :  { %v523_v51 = vpop.eup %522  ;;  %v299_v58 = vadd.f32 %v295_v56, %v169_v55  ;;  %v236_v55 = vld [vmem:[%s976_s10 + $0x30] sm:$0xff]  ;;  %v235_v56 = vld [vmem:[%s976_s10 + $0x28] sm:$0xff] }
  0xb4   :  { %v303_v52 = vadd.f32 1.0, %v523_v51  ;;  %v240_v51 = vld [vmem:[%s976_s10 + $0x50] sm:$0xff] }
  0xb5   :  { %v506_v6 = vmul.f32 -1.442695, %v299_v58  ;;  %399 = vmatpush.msrb.mxu2 %v240_v51 }
  0xb6   :  { %524 = vrcp.f32 %v303_v52  ;;  %v315_v61 = vand.u32 2147483648, %v303_v52  ;;  %v313_v63 = vand.u32 2147483647, %v303_v52  ;;  %vm309_vm2 = vweird.f32 %v303_v52 }
  0xb7   :  { %526 = vtanh.f32 %v299_v58  ;;  %v200_v33 = vpop.f32.mrf.mxu2  ;;  %v233_v58 = vld [vmem:[%s976_s10 + $0x18] sm:$0xff] }
  0xb8   :  { %v316_v2 = vor.u32 1.1754944e-38, %v315_v61  ;;  %vm314_vm4 = vcmp.eq.f32.partialorder %v313_v63, 8.507059e+37  ;;  %528 = vpow2.f32 %v506_v6  ;;  %v230_v61 = vld [vmem:[%s976_s10] sm:$0xff] }
  0xb9   :  { %v520_v63 = vld [vmem:[%s975_s9] ss:$0 sm:$0xff] }
  0xbc   :  { %v525_v57 = vpop.eup %524 }
  0xbd   :  { %v305_v59 = vmul.f32 %v525_v57, %v303_v52  ;;  %vm310_vm1 = vweird.f32 %v525_v57  ;;  %v527_v1 = vpop.eup %526  ;;  %v239_v52 = vld [vmem:[%s976_s10 + $0x48] sm:$0xff] }
  0xbe   :  { %vm311_vm3 = vmor %vm309_vm2, %vm310_vm1  ;;  %v529_v7 = vpop.eup %528  ;;  %400 = vmatpush.msrb.mxu2 %v239_v52 }
  0xbf   :  { %v306_v60 = vsub.f32 1.0, %v305_v59  ;;  %v323_v8 = vadd.f32 1.0, %v529_v7  ;;  %v232_v59 = vld [vmem:[%s976_s10 + $0x10] sm:$0xff] }
  0xc0   :  { %401 = vmatpush.msrb.mxu2 %v238_v53 }
  0xc1   :  { %v307_v62 = vmul.f32 %v525_v57, %v306_v60  ;;  %530 = vrcp.f32 %v323_v8  ;;  %vm329_vm5 = vweird.f32 %v323_v8  ;;  %v335_v25 = vand.u32 2147483648, %v323_v8  ;;  %v231_v60 = vld [vmem:[%s976_s10 + $0x8] sm:$0xff] }
  0xc2   :  { %v333_v27 = vand.u32 2147483647, %v323_v8  ;;  %402 = vmatpush.msrb.mxu2 %v237_v54 }
  0xc3   :  { %v308_v0 = vadd.f32 %v525_v57, %v307_v62  ;;  %v336_v28 = vor.u32 1.1754944e-38, %v335_v25 }
  0xc4   :  { %vm334_vm8 = vcmp.eq.f32.partialorder %v333_v27, 8.507059e+37  ;;  %403 = vmatpush.msrb.mxu2 %v236_v55 }
  0xc5   :  { %v312_v3 = vsel %vm311_vm3, %v525_v57, %v308_v0  ;;  %v234_v57 = vld [vmem:[%s976_s10 + $0x20] sm:$0xff] }
  0xc6   :  { %v317_v4 = vsel %vm314_vm4, %v316_v2, %v312_v3  ;;  %404 = vmatpush.msrb.mxu2 %v235_v56  ;;  %v521_v3 = vld [vmem:[%s977_s11] ss:$0 sm:$0xff]  ;;  %s472_s11 = sshll.u32 %s978_s12, 4  ;;  %s702_s12 = smov [#allocation11]   ;;  %s473_s11 = int_to_ptr.hbm [resolvable:$true] %s472_s11 }
  0xc7   :  { %v344_v5 = vmul.f32 %v527_v1, %v317_v4  ;;  %v531_v9 = vpop.eup %530  ;;  %v343_v21 = vmul.f32 %v341_v14, %v317_v4  ;;  %s481_s21 = sshll.u32 %s702_s12, 4  ;;  %s482_s21 = int_to_ptr.vmem [resolvable:$true] %s481_s21 }
  0xc8   :  { %v325_v12 = vmul.f32 %v531_v9, %v323_v8  ;;  %vm330_vm6 = vweird.f32 %v531_v9  ;;  %405 = vmatpush.msrb.mxu2 %v234_v57 }
  0xc9   :  { %346 = vrot.lane.b32.xlu0 %v344_v5, %s700_s16  ;;  %vm331_vm7 = vmor %vm329_vm5, %vm330_vm6 }
  0xca   :  { %v326_v16 = vsub.f32 1.0, %v325_v12  ;;  %406 = vmatpush.msrb.mxu2 %v233_v58 }
  0xcc   :  { %v327_v19 = vmul.f32 %v531_v9, %v326_v16  ;;  %407 = vmatpush.msrb.mxu2 %v232_v59 }
  0xce   :  { %v328_v26 = vadd.f32 %v531_v9, %v327_v19  ;;  %408 = vmatpush.msrb.mxu2 %v231_v60 }
  0xd0   :  { %v332_v29 = vsel %vm331_vm7, %v531_v9, %v328_v26  ;;  %409 = vmatpush.msrb.mxu2 %v230_v61 }
  0xd1   :  { %v337_v31 = vsel %vm334_vm8, %v336_v28, %v332_v29 }
 0x13b   :  { %v347_v22 = vpop.permute.xlu0 %346 }
 0x13c   :  { %v349_v24 = vadd.f32 %v347_v22, %v343_v21 }
 0x13e   :  { %532 = vtanh.f32 %v349_v24 }
 0x144   :  { %v533_v30 = vpop.eup %532 }
 0x145   :  { %v351_v32 = vmul.f32 %v533_v30, %v337_v31 }
 0x147   :  { %356 = vrot.lane.b32.xlu1 %v351_v32, %s700_s16 }
 0x14f   :  { %382 = vrot.lane.b32.xlu1 %v200_v33, %s700_s16 }
 0x1b9   :  { %v357_v43 = vpop.permute.xlu1 %356 }
 0x1ba   :  { %v461_v44 = vsel %vm127_vm0, %v357_v43, %v349_v24  ;;  %507 = vmatmul.msk.f32.vlgmr.msrb.gmra.mxu1 %vm127_vm0, %v357_v43 }
 0x1bb   :  { %462 = vst [vmem:[#allocation10] sm:$0xff] %v461_v44 }
 0x1c1   :  { %v383_v45 = vpop.permute.xlu1 %382 }
 0x1c2   :  { %v385_v46 = vmul.f32 %v383_v45, %v351_v32 }
 0x1c4   :  { %387 = vrot.lane.b32.xlu2 %v385_v46, %s700_s16  ;;  %s701_s16 = smov [#allocation10]  }
 0x1c5   :  { %s470_s3 = sshll.u32 %s701_s16, 4  ;;  %s471_s3 = int_to_ptr.vmem [resolvable:$true] %s470_s3 }
 0x1c6   :  { %475 = dma.vmem_to_hbm [thread:$0]  %s471_s3, 128, %s473_s11, [#allocation4]  }
 0x21e   :  { %v388_v62 = vpop.permute.xlu2 %387 }
 0x21f   :  { %508 = vmatmul.msk.f32.vlgmr.msrb.gmra.mxu3 %vm127_vm0, %v388_v62 }
 0x237   :  { %v377_v0 = vpop.f32.mrf.mxu1 }
 0x238   :  { %v378_v1 = vadd.f32 %v520_v63, %v377_v0 }
 0x23a   :  { %v380_v2 = vmax.f32 %v378_v1, 0.0 }
 0x23c   :  { %410 = vmatmul.f32.vlgmr.msrb.gmra.mxu2 %v380_v2 }
 0x2a2   :  { %v431_v6 = vpop.f32.mrf.mxu3 }
 0x2bf   :  { %v411_v4 = vpop.f32.mrf.mxu2 }
 0x2c0   :  { %v412_v5 = vadd.f32 %v521_v3, %v411_v4 }
 0x2c2   :  { %v432_v7 = vadd.f32 %v431_v6, %v412_v5 }
 0x2c4   :  { %v435_v8 = vsel %vm434_vm9, %v432_v7, -inf }
 0x2c5   :  { %436 = vmax.xlane.f32.xlu2 %v435_v8 }
 0x338   :  { %v437_v9 = vpop.xlane.xlu2 %436 }
 0x339   :  { %v438_v10 = vsub.f32 %v432_v7, %v437_v9 }
 0x33b   :  { %v439_v11 = vmul.f32 1.442695, %v438_v10 }
 0x33d   :  { %534 = vpow2.f32 %v439_v11 }
 0x343   :  { %v535_v12 = vpop.eup %534 }
 0x344   :  { %v441_v13 = vsel %vm434_vm9, %v535_v12, 0.0 }
 0x345   :  { %442 = vadd.xlane.f32.xlu0 %v441_v13 }
 0x3b8   :  { %v443_v14 = vpop.xlane.xlu0 %442 }
 0x3b9   :  { %536 = vrcp.f32 %v443_v14  ;;  %v455_v18 = vand.u32 2147483648, %v443_v14  ;;  %v453_v20 = vand.u32 2147483647, %v443_v14  ;;  %vm449_vm11 = vweird.f32 %v443_v14 }
 0x3bb   :  { %v456_v22 = vor.u32 1.1754944e-38, %v455_v18  ;;  %vm454_vm13 = vcmp.eq.f32.partialorder %v453_v20, 8.507059e+37 }
 0x3bf   :  { %v537_v15 = vpop.eup %536 }
 0x3c0   :  { %v445_v16 = vmul.f32 %v537_v15, %v443_v14  ;;  %vm450_vm10 = vweird.f32 %v537_v15 }
 0x3c1   :  { %vm451_vm12 = vmor %vm449_vm11, %vm450_vm10 }
 0x3c2   :  { %v446_v17 = vsub.f32 1.0, %v445_v16 }
 0x3c4   :  { %v447_v19 = vmul.f32 %v537_v15, %v446_v17 }
 0x3c6   :  { %v448_v21 = vadd.f32 %v537_v15, %v447_v19 }
 0x3c8   :  { %v452_v23 = vsel %vm451_vm12, %v537_v15, %v448_v21 }
 0x3c9   :  { %v457_v24 = vsel %vm454_vm13, %v456_v22, %v452_v23 }
 0x3ca   :  { %v458_v25 = vmul.f32 %v535_v12, %v457_v24 }
 0x3cc   :  { %v459_v26 = vsel %vm434_vm9, %v458_v25, %v432_v7 }
 0x3cd   :  { %464 = vst.msk [vmem:[#allocation11] sm:$0xff] %vm463_vm14, %v459_v26 }
 0x3ce   :  { %486 = dma.vmem_to_hbm [thread:$0]  %s482_s21, 128, %s484_s0, [#allocation12]  }
 0x3cf   :  { %688 = dma.done.wait [#allocation4], 128  }
 0x3d0   :  { %689 = vsyncadd [#allocation4], 4294967168 }
 0x3d1   :  { %690 = dma.done.wait [#allocation12], 128  }
 0x3d2   :  { %691 = vsyncadd [#allocation12], 4294967168 }
 0x3d3   :  { %495 = vsyncpa [#allocation3], 1 }
 0x3d4   :  { %496 = vsyncpa [#allocation6], 1 }
 0x3d5   :  { %497 = vsyncpa [#allocation9], 1 }
 0x3d6   :  { %498 = vsyncpa [#allocation4], 1 }
 0x3d7   :  { %499 = vsyncpa [#allocation12], 1 }

</bundles_post_ra>
